<compile_context>
chip_gen: v7x
topology: tpu7x:2x2x1
jax: 0.10.0
libtpu: 0.0.40
codegen_flags: <defaults>
</compile_context>

<pallas_src>
import functools

import numpy as np
import jax
import jax.numpy as jnp
from jax.experimental import pallas as pl
from jax.experimental.pallas import tpu as pltpu

N = 4          # n_nodes
H = 32         # controller hidden width
LANES = 128    # states per kernel tile (lane axis)

# ---- params slab layout: (40, 128) f32, zero everywhere outside the regions ----
_P_ROWS = 40
_W2T_R, _W2T_L = 0, 0      # rows 0:32,  lanes  0:32  W2^T (out,in)
_W1T_R, _W1T_L = 0, H      # rows 0:32,  lanes 32:36  W1^T (out,in)
_B1_L = 36                 # rows 0:32,  lane  36     b1 column
_B2_L = 37                 # rows 0:32,  lane  37     b2 column
_W3T_R, _W3T_L = H, 0      # rows 32:36, lanes  0:32  W3^T (out,in); rows 36:40 zero pad
_ADJT_R, _ADJT_L = H, H    # rows 32:36, lanes 32:36  adj^T
_B3_L = 36                 # rows 32:36, lane  36     b3 column; rows 36:40 zero pad


def _elu(h):
    # ELU(alpha=1): h if h > 0 else exp(h)-1 (exp arg clamped; both branches eval'd)
    return jnp.where(h > 0, h, jnp.exp(jnp.minimum(h, 0.0)) - 1.0)


def kuramoto_kernel(x_ref, params_ref, out_ref):
    # x_ref / out_ref: (2N, LANES) tile; each lane is an independent state.
    x1 = x_ref[0:N, :]           # (N, B) angles
    x2 = x_ref[N:2 * N, :]       # (N, B) velocities

    # Static slices of the resident params slab (free).
    w2t = params_ref[_W2T_R:_W2T_R + H, _W2T_L:_W2T_L + H]       # (H, H)
    w1t = params_ref[_W1T_R:_W1T_R + H, _W1T_L:_W1T_L + N]       # (H, N)
    b1c = params_ref[0:H, _B1_L:_B1_L + 1]                       # (H, 1)
    b2c = params_ref[0:H, _B2_L:_B2_L + 1]                       # (H, 1)
    w3t8 = params_ref[_W3T_R:_W3T_R + 8, _W3T_L:_W3T_L + H]      # (8, H), rows 4:8 zero
    b3c8 = params_ref[_W3T_R:_W3T_R + 8, _B3_L:_B3_L + 1]        # (8, 1), rows 4:8 zero
    adjt = params_ref[_ADJT_R:_ADJT_R + N, _ADJT_L:_ADJT_L + N]  # (N, N), adjt[j,i]=adj[i,j]

    # ---- pairwise coupling, elementwise per lane on the VPU ----------------
    # s[j,b] = sum_i adj[i,j] * cos(x1[j,b]-x1[i,b]) * (x2[j,b]-x2[i,b])
    s = jnp.zeros_like(x1)
    for i in range(N):  # static unroll, N = 4
        a_i = adjt[:, i:i + 1]                                   # (N, 1)
        s = s + a_i * jnp.cos(x1 - x1[i:i + 1, :]) * (x2 - x2[i:i + 1, :])

    # ---- controller MLP, column-major: (out,in) @ (in, B) ------------------
    # Layer 1 contraction depth is only 4 -> VPU broadcast-FMA (MXU would be wasted).
    h1p = b1c + w1t[:, 0:1] * x2[0:1, :]
    for i in range(1, N):
        h1p = h1p + w1t[:, i:i + 1] * x2[i:i + 1, :]
    h1 = _elu(h1p)                                               # (H, B)
    # Layers 2/3 are real matmuls over the lane-batched states -> MXU.
    h2 = _elu(jnp.dot(w2t, h1, preferred_element_type=jnp.float32,
                      precision=jax.lax.Precision.HIGHEST) + b2c)          # (H, B)
    u8 = _elu(jnp.dot(w3t8, h2, preferred_element_type=jnp.float32,
                      precision=jax.lax.Precision.HIGHEST) + b3c8)         # (8, B)
    u = u8[0:N, :]                                               # (N, B)

    dxdt = 1.25 * u * s                                          # == 5 * (u/4) * s

    # Single unmasked full-width store (value built in-register).
    out_ref[...] = jnp.concatenate([x2, dxdt], axis=0)           # (2N, B)


def pack_params(adj, w1, b1, w2, b2, w3, b3):
    """Pack all constants into one (40, 128) f32 slab (done once, reused forever).

    Weights are in (in, out) layout (= transpose of PyTorch Linear.weight).
    """
    p = jnp.zeros((_P_ROWS, LANES), jnp.float32)
    p = p.at[_W2T_R:_W2T_R + H, _W2T_L:_W2T_L + H].set(w2.T)
    p = p.at[_W1T_R:_W1T_R + H, _W1T_L:_W1T_L + N].set(w1.T)
    p = p.at[0:H, _B1_L].set(b1)
    p = p.at[0:H, _B2_L].set(b2)
    p = p.at[_W3T_R:_W3T_R + N, _W3T_L:_W3T_L + H].set(w3.T)
    p = p.at[_ADJT_R:_ADJT_R + N, _ADJT_L:_ADJT_L + N].set(adj.T)
    p = p.at[_W3T_R:_W3T_R + N, _B3_L].set(b3)
    return p


@functools.lru_cache(maxsize=None)
def _build_call(num_tiles):
    """pallas_call over a (2N, num_tiles*128) slab of lane-batched states."""
    return pl.pallas_call(
        kuramoto_kernel,
        out_shape=jax.ShapeDtypeStruct((2 * N, num_tiles * LANES), jnp.float32),
        grid=(num_tiles,),
        in_specs=[
            pl.BlockSpec((2 * N, LANES), lambda i: (0, i)),        # state tile
            pl.BlockSpec((_P_ROWS, LANES), lambda i: (0, 0)),      # params: resident
        ],
        out_specs=pl.BlockSpec((2 * N, LANES), lambda i: (0, i)),
        compiler_params=pltpu.CompilerParams(
            dimension_semantics=("parallel",)),                    # megacore on v7x
    )


@jax.jit
def kuramoto_forward_batched(t, x_batch, params_slab):
    """Batched forward: x_batch (2N, B) of independent states -> (2N, B)."""
    del t  # time is unused by the module's forward
    b = x_batch.shape[1]
    num_tiles = max(1, -(-b // LANES))
    bp = num_tiles * LANES
    if bp != b:
        x_batch = jnp.pad(x_batch, ((0, 0), (0, bp - b)))
    out = _build_call(num_tiles)(x_batch.astype(jnp.float32), params_slab)
    return out[:, :b]


@jax.jit
def kuramoto_forward(t, x_col, params_slab):
    """Single-state forward matching the PyTorch module: (2N, 1) -> (2N, 1)."""
    del t
    x_b = jnp.broadcast_to(x_col.astype(jnp.float32), (2 * N, LANES))
    out = _build_call(1)(x_b, params_slab)
    return out[:, 0:1]


if __name__ == "__main__":
    key = jax.random.PRNGKey(0)
    k_x, k_xb, k_w1, k_b1, k_w2, k_b2, k_w3, k_b3 = jax.random.split(key, 8)

    # Weights in (in, out) layout = transpose of PyTorch's Linear.weight.
    w1 = jax.random.normal(k_w1, (N, H), jnp.float32) * 0.1
    b1 = jax.random.normal(k_b1, (H,), jnp.float32) * 0.1
    w2 = jax.random.normal(k_w2, (H, H), jnp.float32) * 0.1
    b2 = jax.random.normal(k_b2, (H,), jnp.float32) * 0.1
    w3 = jax.random.normal(k_w3, (H, N), jnp.float32) * 0.1
    b3 = jax.random.normal(k_b3, (N,), jnp.float32) * 0.1
    # Adjacency: fully connected without self-loops (deterministic).
    adj = jnp.ones((N, N), jnp.float32) - jnp.eye(N, dtype=jnp.float32)

    params_slab = pack_params(adj, w1, b1, w2, b2, w3, b3)

    # ---- single state (the module's forward signature) ---------------------
    x = jax.random.normal(k_x, (2 * N, 1), jnp.float32)
    out1 = kuramoto_forward(0.0, x, params_slab)
    jax.block_until_ready(out1)
    assert out1.shape == (2 * N, 1)

    # ---- lane-batched states: 256 independent states, 2 grid steps ---------
    B = 256
    xb = jax.random.normal(k_xb, (2 * N, B), jnp.float32)
    outb = kuramoto_forward_batched(0.0, xb, params_slab)
    jax.block_until_ready(outb)
    assert outb.shape == (2 * N, B)

    # ---- float64 numpy reference mirroring the PyTorch forward -------------
    adj64 = np.asarray(adj, np.float64)
    w1_64, b1_64 = np.asarray(w1, np.float64), np.asarray(b1, np.float64)
    w2_64, b2_64 = np.asarray(w2, np.float64), np.asarray(b2, np.float64)
    w3_64, b3_64 = np.asarray(w3, np.float64), np.asarray(b3, np.float64)

    def ref_one(xc):
        xc = np.asarray(xc, np.float64)
        x1_, x2_ = xc[0:N], xc[N:2 * N]
        g = np.cos(x1_[None, :] - x1_[:, None])
        xij = x2_[None, :] - x2_[:, None]
        s = (adj64 * g * xij).sum(axis=0)

        def elu(v):
            return np.where(v > 0, v, np.exp(np.minimum(v, 0.0)) - 1.0)

        h = x2_[None, :]
        h = elu(h @ w1_64 + b1_64)
        h = elu(h @ w2_64 + b2_64)
        u = elu(h @ w3_64 + b3_64)[0]
        dxdt = 5.0 * (u / 4.0) * s
        return np.concatenate([x2_, dxdt])

    ref1 = ref_one(np.asarray(x)[:, 0]).reshape(2 * N, 1)
    np.testing.assert_allclose(np.asarray(out1), ref1, atol=2e-5, rtol=1e-3)

    refb = np.stack([ref_one(np.asarray(xb)[:, j]) for j in range(B)], axis=1)
    np.testing.assert_allclose(np.asarray(outb), refb, atol=2e-5, rtol=1e-3)

    print("KERNEL_OK")
</pallas_src>

<mosaic_0001>
module attributes {stable_mosaic.version = 11 : i64} {
  func.func @kuramoto_kernel(%arg0: i32, %arg1: memref<8x128xf32, #tpu.memory_space<vmem>>, %arg2: memref<40x128xf32, #tpu.memory_space<vmem>>, %arg3: memref<8x128xf32, #tpu.memory_space<vmem>>) attributes {dimension_semantics = [#tpu.dimension_semantics<parallel>], iteration_bounds = array<i64: 1>, scalar_prefetch = 0 : i64, scratch_operands = 0 : i64, tpu.core_type = #tpu.core_type<tc>, window_params = [{transform_indices = @transform_0, window_bounds = array<i64: 8, 128>}, {pipeline_mode = #tpu.pipeline_mode<synchronous>, transform_indices = @transform_1, window_bounds = array<i64: 40, 128>}, {transform_indices = @transform_2, window_bounds = array<i64: 8, 128>}]} {
    %c0 = arith.constant 0 : index
    %c0_0 = arith.constant 0 : index
    %0 = vector.load %arg1[%c0, %c0_0] : memref<8x128xf32, #tpu.memory_space<vmem>>, vector<4x128xf32>
    %c4 = arith.constant 4 : index
    %c0_1 = arith.constant 0 : index
    %1 = vector.load %arg1[%c4, %c0_1] : memref<8x128xf32, #tpu.memory_space<vmem>>, vector<4x128xf32>
    %c0_2 = arith.constant 0 : index
    %c0_3 = arith.constant 0 : index
    %2 = vector.load %arg2[%c0_2, %c0_3] : memref<40x128xf32, #tpu.memory_space<vmem>>, vector<32x32xf32>
    %c0_4 = arith.constant 0 : index
    %c32 = arith.constant 32 : index
    %3 = vector.load %arg2[%c0_4, %c32] : memref<40x128xf32, #tpu.memory_space<vmem>>, vector<32x4xf32>
    %c0_5 = arith.constant 0 : index
    %c36 = arith.constant 36 : index
    %4 = vector.load %arg2[%c0_5, %c36] : memref<40x128xf32, #tpu.memory_space<vmem>>, vector<32x1xf32>
    %c0_6 = arith.constant 0 : index
    %c37 = arith.constant 37 : index
    %5 = vector.load %arg2[%c0_6, %c37] : memref<40x128xf32, #tpu.memory_space<vmem>>, vector<32x1xf32>
    %c32_7 = arith.constant 32 : index
    %c0_8 = arith.constant 0 : index
    %6 = vector.load %arg2[%c32_7, %c0_8] : memref<40x128xf32, #tpu.memory_space<vmem>>, vector<8x32xf32>
    %c32_9 = arith.constant 32 : index
    %c36_10 = arith.constant 36 : index
    %7 = vector.load %arg2[%c32_9, %c36_10] : memref<40x128xf32, #tpu.memory_space<vmem>>, vector<8x1xf32>
    %c32_11 = arith.constant 32 : index
    %c32_12 = arith.constant 32 : index
    %8 = vector.load %arg2[%c32_11, %c32_12] : memref<40x128xf32, #tpu.memory_space<vmem>>, vector<4x4xf32>
    %cst = arith.constant 0.000000e+00 : f32
    %9 = vector.broadcast %cst : f32 to vector<4x128xf32>
    %10 = vector.extract_strided_slice %8 {offsets = [0, 0], sizes = [4, 1], strides = [1, 1]} : vector<4x4xf32> to vector<4x1xf32>
    %11 = vector.extract_strided_slice %0 {offsets = [0, 0], sizes = [1, 128], strides = [1, 1]} : vector<4x128xf32> to vector<1x128xf32>
    %12 = vector.broadcast %11 : vector<1x128xf32> to vector<4x128xf32>
    %13 = arith.subf %0, %12 : vector<4x128xf32>
    %14 = math.cos %13 : vector<4x128xf32>
    %15 = vector.broadcast %10 : vector<4x1xf32> to vector<4x128xf32>
    %16 = arith.mulf %15, %14 : vector<4x128xf32>
    %17 = vector.extract_strided_slice %1 {offsets = [0, 0], sizes = [1, 128], strides = [1, 1]} : vector<4x128xf32> to vector<1x128xf32>
    %18 = vector.broadcast %17 : vector<1x128xf32> to vector<4x128xf32>
    %19 = arith.subf %1, %18 : vector<4x128xf32>
    %20 = arith.mulf %16, %19 : vector<4x128xf32>
    %21 = arith.addf %9, %20 : vector<4x128xf32>
    %22 = vector.extract_strided_slice %8 {offsets = [0, 1], sizes = [4, 1], strides = [1, 1]} : vector<4x4xf32> to vector<4x1xf32>
    %23 = vector.extract_strided_slice %0 {offsets = [1, 0], sizes = [1, 128], strides = [1, 1]} : vector<4x128xf32> to vector<1x128xf32>
    %24 = vector.broadcast %23 : vector<1x128xf32> to vector<4x128xf32>
    %25 = arith.subf %0, %24 : vector<4x128xf32>
    %26 = math.cos %25 : vector<4x128xf32>
    %27 = vector.broadcast %22 : vector<4x1xf32> to vector<4x128xf32>
    %28 = arith.mulf %27, %26 : vector<4x128xf32>
    %29 = vector.extract_strided_slice %1 {offsets = [1, 0], sizes = [1, 128], strides = [1, 1]} : vector<4x128xf32> to vector<1x128xf32>
    %30 = vector.broadcast %29 : vector<1x128xf32> to vector<4x128xf32>
    %31 = arith.subf %1, %30 : vector<4x128xf32>
    %32 = arith.mulf %28, %31 : vector<4x128xf32>
    %33 = arith.addf %21, %32 : vector<4x128xf32>
    %34 = vector.extract_strided_slice %8 {offsets = [0, 2], sizes = [4, 1], strides = [1, 1]} : vector<4x4xf32> to vector<4x1xf32>
    %35 = vector.extract_strided_slice %0 {offsets = [2, 0], sizes = [1, 128], strides = [1, 1]} : vector<4x128xf32> to vector<1x128xf32>
    %36 = vector.broadcast %35 : vector<1x128xf32> to vector<4x128xf32>
    %37 = arith.subf %0, %36 : vector<4x128xf32>
    %38 = math.cos %37 : vector<4x128xf32>
    %39 = vector.broadcast %34 : vector<4x1xf32> to vector<4x128xf32>
    %40 = arith.mulf %39, %38 : vector<4x128xf32>
    %41 = vector.extract_strided_slice %1 {offsets = [2, 0], sizes = [1, 128], strides = [1, 1]} : vector<4x128xf32> to vector<1x128xf32>
    %42 = vector.broadcast %41 : vector<1x128xf32> to vector<4x128xf32>
    %43 = arith.subf %1, %42 : vector<4x128xf32>
    %44 = arith.mulf %40, %43 : vector<4x128xf32>
    %45 = arith.addf %33, %44 : vector<4x128xf32>
    %46 = vector.extract_strided_slice %8 {offsets = [0, 3], sizes = [4, 1], strides = [1, 1]} : vector<4x4xf32> to vector<4x1xf32>
    %47 = vector.extract_strided_slice %0 {offsets = [3, 0], sizes = [1, 128], strides = [1, 1]} : vector<4x128xf32> to vector<1x128xf32>
    %48 = vector.broadcast %47 : vector<1x128xf32> to vector<4x128xf32>
    %49 = arith.subf %0, %48 : vector<4x128xf32>
    %50 = math.cos %49 : vector<4x128xf32>
    %51 = vector.broadcast %46 : vector<4x1xf32> to vector<4x128xf32>
    %52 = arith.mulf %51, %50 : vector<4x128xf32>
    %53 = vector.extract_strided_slice %1 {offsets = [3, 0], sizes = [1, 128], strides = [1, 1]} : vector<4x128xf32> to vector<1x128xf32>
    %54 = vector.broadcast %53 : vector<1x128xf32> to vector<4x128xf32>
    %55 = arith.subf %1, %54 : vector<4x128xf32>
    %56 = arith.mulf %52, %55 : vector<4x128xf32>
    %57 = arith.addf %45, %56 : vector<4x128xf32>
    %58 = vector.extract_strided_slice %3 {offsets = [0, 0], sizes = [32, 1], strides = [1, 1]} : vector<32x4xf32> to vector<32x1xf32>
    %59 = vector.extract_strided_slice %1 {offsets = [0, 0], sizes = [1, 128], strides = [1, 1]} : vector<4x128xf32> to vector<1x128xf32>
    %60 = vector.broadcast %58 : vector<32x1xf32> to vector<32x128xf32>
    %61 = vector.broadcast %59 : vector<1x128xf32> to vector<32x128xf32>
    %62 = arith.mulf %60, %61 : vector<32x128xf32>
    %63 = vector.broadcast %4 : vector<32x1xf32> to vector<32x128xf32>
    %64 = arith.addf %63, %62 : vector<32x128xf32>
    %65 = vector.extract_strided_slice %3 {offsets = [0, 1], sizes = [32, 1], strides = [1, 1]} : vector<32x4xf32> to vector<32x1xf32>
    %66 = vector.extract_strided_slice %1 {offsets = [1, 0], sizes = [1, 128], strides = [1, 1]} : vector<4x128xf32> to vector<1x128xf32>
    %67 = vector.broadcast %65 : vector<32x1xf32> to vector<32x128xf32>
    %68 = vector.broadcast %66 : vector<1x128xf32> to vector<32x128xf32>
    %69 = arith.mulf %67, %68 : vector<32x128xf32>
    %70 = arith.addf %64, %69 : vector<32x128xf32>
    %71 = vector.extract_strided_slice %3 {offsets = [0, 2], sizes = [32, 1], strides = [1, 1]} : vector<32x4xf32> to vector<32x1xf32>
    %72 = vector.extract_strided_slice %1 {offsets = [2, 0], sizes = [1, 128], strides = [1, 1]} : vector<4x128xf32> to vector<1x128xf32>
    %73 = vector.broadcast %71 : vector<32x1xf32> to vector<32x128xf32>
    %74 = vector.broadcast %72 : vector<1x128xf32> to vector<32x128xf32>
    %75 = arith.mulf %73, %74 : vector<32x128xf32>
    %76 = arith.addf %70, %75 : vector<32x128xf32>
    %77 = vector.extract_strided_slice %3 {offsets = [0, 3], sizes = [32, 1], strides = [1, 1]} : vector<32x4xf32> to vector<32x1xf32>
    %78 = vector.extract_strided_slice %1 {offsets = [3, 0], sizes = [1, 128], strides = [1, 1]} : vector<4x128xf32> to vector<1x128xf32>
    %79 = vector.broadcast %77 : vector<32x1xf32> to vector<32x128xf32>
    %80 = vector.broadcast %78 : vector<1x128xf32> to vector<32x128xf32>
    %81 = arith.mulf %79, %80 : vector<32x128xf32>
    %82 = arith.addf %76, %81 : vector<32x128xf32>
    %cst_13 = arith.constant 0.000000e+00 : f32
    %83 = vector.broadcast %cst_13 : f32 to vector<32x128xf32>
    %84 = arith.cmpf ogt, %82, %83 : vector<32x128xf32>
    %cst_14 = arith.constant 0.000000e+00 : f32
    %85 = vector.broadcast %cst_14 : f32 to vector<32x128xf32>
    %86 = arith.minimumf %82, %85 : vector<32x128xf32>
    %87 = math.exp %86 : vector<32x128xf32>
    %cst_15 = arith.constant 1.000000e+00 : f32
    %88 = vector.broadcast %cst_15 : f32 to vector<32x128xf32>
    %89 = arith.subf %87, %88 : vector<32x128xf32>
    %90 = arith.select %84, %82, %89 : vector<32x128xi1>, vector<32x128xf32>
    %cst_16 = arith.constant dense<0.000000e+00> : vector<32x128xf32>
    %91 = tpu.matmul %2, %90, %cst_16 {dimension_numbers = #tpu.dot_dimension_numbers<[1], [0], [0], [1], [0, 0, 1, 1], [], []>, precision = #tpu.contract_precision<fp32>} : vector<32x32xf32>, vector<32x128xf32>, vector<32x128xf32> -> vector<32x128xf32>
    %92 = vector.broadcast %5 : vector<32x1xf32> to vector<32x128xf32>
    %93 = arith.addf %91, %92 : vector<32x128xf32>
    %cst_17 = arith.constant 0.000000e+00 : f32
    %94 = vector.broadcast %cst_17 : f32 to vector<32x128xf32>
    %95 = arith.cmpf ogt, %93, %94 : vector<32x128xf32>
    %cst_18 = arith.constant 0.000000e+00 : f32
    %96 = vector.broadcast %cst_18 : f32 to vector<32x128xf32>
    %97 = arith.minimumf %93, %96 : vector<32x128xf32>
    %98 = math.exp %97 : vector<32x128xf32>
    %cst_19 = arith.constant 1.000000e+00 : f32
    %99 = vector.broadcast %cst_19 : f32 to vector<32x128xf32>
    %100 = arith.subf %98, %99 : vector<32x128xf32>
    %101 = arith.select %95, %93, %100 : vector<32x128xi1>, vector<32x128xf32>
    %cst_20 = arith.constant dense<0.000000e+00> : vector<8x128xf32>
    %102 = tpu.matmul %6, %101, %cst_20 {dimension_numbers = #tpu.dot_dimension_numbers<[1], [0], [0], [1], [0, 0, 1, 1], [], []>, precision = #tpu.contract_precision<fp32>} : vector<8x32xf32>, vector<32x128xf32>, vector<8x128xf32> -> vector<8x128xf32>
    %103 = vector.broadcast %7 : vector<8x1xf32> to vector<8x128xf32>
    %104 = arith.addf %102, %103 : vector<8x128xf32>
    %cst_21 = arith.constant 0.000000e+00 : f32
    %105 = vector.broadcast %cst_21 : f32 to vector<8x128xf32>
    %106 = arith.cmpf ogt, %104, %105 : vector<8x128xf32>
    %cst_22 = arith.constant 0.000000e+00 : f32
    %107 = vector.broadcast %cst_22 : f32 to vector<8x128xf32>
    %108 = arith.minimumf %104, %107 : vector<8x128xf32>
    %109 = math.exp %108 : vector<8x128xf32>
    %cst_23 = arith.constant 1.000000e+00 : f32
    %110 = vector.broadcast %cst_23 : f32 to vector<8x128xf32>
    %111 = arith.subf %109, %110 : vector<8x128xf32>
    %112 = arith.select %106, %104, %111 : vector<8x128xi1>, vector<8x128xf32>
    %113 = vector.extract_strided_slice %112 {offsets = [0, 0], sizes = [4, 128], strides = [1, 1]} : vector<8x128xf32> to vector<4x128xf32>
    %cst_24 = arith.constant 1.250000e+00 : f32
    %114 = vector.broadcast %cst_24 : f32 to vector<4x128xf32>
    %115 = arith.mulf %114, %113 : vector<4x128xf32>
    %116 = arith.mulf %115, %57 : vector<4x128xf32>
    %117 = tpu.concatenate %1, %116 in 0 : vector<4x128xf32>, vector<4x128xf32> -> vector<8x128xf32>
    %c0_25 = arith.constant 0 : index
    %c0_26 = arith.constant 0 : index
    %118 = vector.load %arg3[%c0_25, %c0_26] : memref<8x128xf32, #tpu.memory_space<vmem>>, vector<8x128xf32>
    tpu.vector_store %arg3[%c0_25, %c0_26], %117 {strides = array<i32>} : memref<8x128xf32, #tpu.memory_space<vmem>>, vector<8x128xf32>,
    return
  }
  func.func @transform_0(%arg0: i32) -> (i32, i32) {
    %c0_i32 = arith.constant 0 : i32
    %c0_i32_0 = arith.constant 0 : i32
    return %c0_i32, %arg0 : i32, i32
  }
  func.func @transform_1(%arg0: i32) -> (i32, i32) {
    %c0_i32 = arith.constant 0 : i32
    %c0_i32_0 = arith.constant 0 : i32
    %c0_i32_1 = arith.constant 0 : i32
    return %c0_i32, %c0_i32_0 : i32, i32
  }
  func.func @transform_2(%arg0: i32) -> (i32, i32) {
    %c0_i32 = arith.constant 0 : i32
    %c0_i32_0 = arith.constant 0 : i32
    return %c0_i32, %arg0 : i32, i32
  }
}

</mosaic_0001>

<bundles_post_ra>
// kernel: kuramoto_forward.1
= control target key start
LH: loop header
LB: loop body
LE: loop exit
PB: predicated region body
PF: predicated region fallthrough
CT: control target
= control target key end

     0   :  { %7 = vsyncpa [#allocation3], 0  ;;  %s2315_s9 = smov [#allocation2]   ;;  %s2973_s0 = inlined_call_operand.vmem [shape: f32[8,128], index: 0, kind: input, shape index: {}]   ;;  %s2974_s1 = inlined_call_operand.hbm [shape: f32[40,128], index: 1, kind: input, shape index: {}]   ;;  %s2975_s2 = inlined_call_operand.vmem [shape: f32[8,128], index: 2, kind: output, shape index: {}]  }
   0x1   :  { %s15_s10 = sshll.u32 %s2315_s9, 4  ;;  %s2291_s13 = scalar_lea.hbm %s2974_s1, 640  ;;  %s16_s10 = int_to_ptr.vmem [resolvable:$true] %s15_s10 }
   0x2   :  { %p2292_p0 = scmp.ne.s32.totalorder %s2974_s1, %s2291_s13  ;;  %p2295_p1 = scmp.lt.u32.totalorder %s2291_s13, %s2974_s1 }
   0x4   :  { %p2297_p2 = pnand %p2295_p1, %p2292_p0 }
   0x6   :  { %2300 = shalt.err (!%p2297_p2)
}
   0x7   :  { %s2301_s18 = scalar_lea.vmem %s16_s10, 640  ;;  %p2306_p4 = scmp.lt.s32.totalorder %s16_s10, %s16_s10 }
   0x8   :  { %p2302_p3 = scmp.ne.s32.totalorder %s16_s10, %s2301_s18  ;;  %p2307_p5 = scmp.lt.s32.totalorder %s2301_s18, %s2301_s18 }
   0xa   :  { %p2308_p6 = por %p2307_p5, %p2306_p4 }
   0xc   :  { %p2309_p7 = pnand %p2308_p6, %p2302_p3 }
   0xe   :  { %2312 = shalt.err (!%p2309_p7)
}
   0xf   :  { %s2316_s19 = smov 128   ;;  %s2317_s20 = smov 8  }
  0x10   :  { %21 = dma.hbm_to_vmem [thread:$0]  %s2974_s1, 640, %s16_s10, [#allocation3], %s2316_s19, %s2316_s19, %s2317_s20  }
  0x11   :  { %2313 = dma.done.wait [#allocation3], 640  }
  0x12   :  { %2314 = vsyncadd [#allocation3], 4294966656  ;;  %v2318_v0 = vmov 36   ;;  %v2319_v1 = vmov 32   ;;  %v27_v2 = vld [vmem:[#allocation2] sm:$0xff]  ;;  %v2361_v3 = vld [vmem:[#allocation2 + $0x8] sm:$0xff]  ;;  %v33_v21 = vlaneseq }
  0x13   :  { %2235 = vset.pattern.permute.xlu1 %v2318_v0  ;;  %2234 = vset.pattern.permute.xlu0 %v2319_v1  ;;  %v2365_v4 = vld [vmem:[#allocation2 + $0x18] sm:$0xff]  ;;  %v2320_v5 = vmov 33   ;;  %v2370_v6 = vld [vmem:[#allocation2 + $0x10] sm:$0xff]  ;;  %v2321_v7 = vmov 34   ;;  %v2322_v8 = vmov 35   ;;  %vm670_vm0 = vcmask 261120  }
  0x14   :  { %539 = vperm.xlu1 %2235, %v27_v2   ;;  %516 = vperm.xlu0 %2234, %v27_v2   ;;  %v671_v9 = vsel %vm670_vm0, %v27_v2, 0  ;;  %v2323_v16 = vmov 37   ;;  %v2407_v24 = vshrl.u32 %v33_v21, 7  ;;  %v26_v27 = vld [vmem:[%s2973_s0 + $0x4] sm:$0xf]  ;;  %vm2325_vm5 = vmmov 0  }
  0x15   :  { %v2394_v10 = vand.u32 4294901760, %v671_v9 }
  0x16   :  { %v35_v26 = vsub.s32 0, %v2407_v24  ;;  %v156_v31 = vsub.s32 1, %v2407_v24  ;;  %v276_v32 = vsub.s32 2, %v2407_v24  ;;  %v396_v39 = vsub.s32 3, %v2407_v24 }
  0x17   :  { %v2397_v11 = vsub.f32 %v671_v9, %v2394_v10 }
  0x18   :  { %543 = vperm.xlu1 %2235, %v2361_v3   ;;  %521 = vperm.xlu0 %2234, %v2361_v3   ;;  %v2415_v30 = vrot.slane %v26_v27, %v35_v26  ;;  %v2422_v36 = vrot.slane %v26_v27, %v156_v31  ;;  %v2427_v38 = vrot.slane %v26_v27, %v276_v32 }
  0x19   :  { %v750_v12 = vand.u32 4294901760, %v2397_v11  ;;  %v2434_v45 = vrot.slane %v26_v27, %v396_v39 }
  0x1b   :  { %v751_v13 = vsub.f32 %v2397_v11, %v750_v12 }
  0x1c   :  { %2236 = vset.pattern.permute.xlu1 %v2320_v5  ;;  %531 = vperm.xlu0 %2234, %v2365_v4  }
  0x1d   :  { %563 = vperm.xlu1 %2236, %v2361_v3   ;;  %v752_v14 = vand.u32 4294901760, %v751_v13 }
  0x1f   :  { %1939 = vmatprep.mubr.f32.mxu0 %v752_v14 }
  0x20   :  { %2239 = vset.pattern.permute.xlu0 %v2318_v0 }
  0x21   :  { %2237 = vset.pattern.permute.xlu1 %v2319_v1  ;;  %547 = vperm.xlu0 %2239, %v2370_v6  }
  0x22   :  { %526 = vperm.xlu1 %2237, %v2370_v6  }
  0x25   :  { %2240 = vset.pattern.permute.xlu0 %v2320_v5 }
  0x26   :  { %2238 = vset.pattern.permute.xlu1 %v2321_v7  ;;  %559 = vperm.xlu0 %2240, %v27_v2  }
  0x27   :  { %583 = vperm.xlu1 %2238, %v27_v2  }
  0x2a   :  { %571 = vperm.xlu0 %2240, %v2365_v4  }
  0x2b   :  { %587 = vperm.xlu1 %2238, %v2361_v3  }
  0x2e   :  { %2244 = vset.pattern.permute.xlu0 %v2321_v7 }
  0x2f   :  { %2241 = vset.pattern.permute.xlu1 %v2318_v0  ;;  %591 = vperm.xlu0 %2244, %v2370_v6  }
  0x30   :  { %551 = vperm.xlu1 %2241, %v2365_v4  }
  0x33   :  { %2247 = vset.pattern.permute.xlu0 %v2322_v8 }
  0x34   :  { %2242 = vset.pattern.permute.xlu1 %v2320_v5  ;;  %619 = vperm.xlu0 %2247, %v2365_v4  }
  0x35   :  { %567 = vperm.xlu1 %2242, %v2370_v6  }
  0x38   :  { %2249 = vset.pattern.permute.xlu0 %v2323_v16 }
  0x39   :  { %2243 = vset.pattern.permute.xlu1 %v2322_v8  ;;  %663 = vperm.xlu0 %2249, %v2370_v6  }
  0x3a   :  { %607 = vperm.xlu1 %2243, %v27_v2  }
  0x3d   :  { %2251 = vset.pattern.permute.xlu0 %v2319_v1 }
  0x3e   :  { %611 = vperm.xlu1 %2243, %v2361_v3  }
  0x42   :  { %2245 = vset.pattern.permute.xlu1 %v2321_v7 }
  0x43   :  { %595 = vperm.xlu1 %2245, %v2365_v4  }
  0x47   :  { %2246 = vset.pattern.permute.xlu1 %v2322_v8 }
  0x48   :  { %615 = vperm.xlu1 %2246, %v2370_v6  }
  0x4c   :  { %2248 = vset.pattern.permute.xlu1 %v2323_v16 }
  0x4d   :  { %655 = vperm.xlu1 %2248, %v27_v2  }
  0x51   :  { %659 = vperm.xlu1 %2248, %v2361_v3  }
  0x55   :  { %667 = vperm.xlu1 %2248, %v2365_v4  }
  0x59   :  { %2250 = vset.pattern.permute.xlu1 %v2318_v0 }
  0x93   :  { %v540_v15 = vpop.permute.xlu1 %539  ;;  %v517_v18 = vpop.permute.xlu0 %516 }
  0x94   :  { %v534_v35 = vmul.f32 %v517_v18, %v2415_v30 }
  0x96   :  { %v554_v40 = vadd.f32 %v540_v15, %v534_v35 }
  0x97   :  { %v544_v17 = vpop.permute.xlu1 %543  ;;  %v522_v20 = vpop.permute.xlu0 %521 }
  0x98   :  { %v535_v42 = vmul.f32 %v522_v20, %v2415_v30 }
  0x9a   :  { %v555_v49 = vadd.f32 %v544_v17, %v535_v42 }
  0x9b   :  { %v532_v23 = vpop.permute.xlu0 %531 }
  0x9c   :  { %v564_v19 = vpop.permute.xlu1 %563  ;;  %v537_v56 = vmul.f32 %v532_v23, %v2415_v30 }
  0x9d   :  { %v575_v46 = vmul.f32 %v564_v19, %v2422_v36 }
  0x9f   :  { %v579_v53 = vadd.f32 %v575_v46, %v555_v49 }
  0xa0   :  { %v548_v28 = vpop.permute.xlu0 %547 }
  0xa1   :  { %v527_v22 = vpop.permute.xlu1 %526 }
  0xa2   :  { %v536_v58 = vmul.f32 %v527_v22, %v2415_v30 }
  0xa4   :  { %v556_v14 = vadd.f32 %v548_v28, %v536_v58 }
  0xa5   :  { %v560_v33 = vpop.permute.xlu0 %559 }
  0xa6   :  { %v584_v25 = vpop.permute.xlu1 %583  ;;  %v574_v37 = vmul.f32 %v560_v33, %v2422_v36 }
  0xa7   :  { %v598_v44 = vmul.f32 %v584_v25, %v2427_v38 }
  0xa8   :  { %v578_v43 = vadd.f32 %v574_v37, %v554_v40 }
  0xa9   :  { %v572_v47 = vpop.permute.xlu0 %571 }
  0xaa   :  { %v588_v29 = vpop.permute.xlu1 %587  ;;  %v602_v50 = vadd.f32 %v598_v44, %v578_v43  ;;  %v577_v63 = vmul.f32 %v572_v47, %v2422_v36  ;;  %v673_v43 = vsel %vm670_vm0, %v2361_v3, 0 }
  0xab   :  { %v599_v51 = vmul.f32 %v588_v29, %v2427_v38 }
  0xad   :  { %v603_v59 = vadd.f32 %v599_v51, %v579_v53  ;;  %v677_v53 = vsel %vm670_vm0, %v2365_v4, 0 }
  0xae   :  { %v592_v54 = vpop.permute.xlu0 %591 }
  0xaf   :  { %v552_v34 = vpop.permute.xlu1 %551  ;;  %v600_v21 = vmul.f32 %v592_v54, %v2427_v38 }
  0xb0   :  { %v557_v62 = vadd.f32 %v552_v34, %v537_v56 }
  0xb2   :  { %v581_v17 = vadd.f32 %v577_v63, %v557_v62 }
  0xb3   :  { %v620_v13 = vpop.permute.xlu0 %619 }
  0xb4   :  { %v568_v41 = vpop.permute.xlu1 %567  ;;  %v625_v19 = vmul.f32 %v620_v13, %v2434_v45 }
  0xb5   :  { %v576_v1 = vmul.f32 %v568_v41, %v2422_v36 }
  0xb7   :  { %v580_v20 = vadd.f32 %v576_v1, %v556_v14 }
  0xb9   :  { %v608_v48 = vpop.permute.xlu1 %607  ;;  %v604_v29 = vadd.f32 %v600_v21, %v580_v20 }
  0xba   :  { %v622_v52 = vmul.f32 %v608_v48, %v2434_v45  ;;  %v675_v48 = vsel %vm670_vm0, %v2370_v6, 0  ;;  %v2467_v6 = vand.u32 4294901760, %v677_v53 }
  0xbc   :  { %v626_v55 = vadd.f32 %v622_v52, %v602_v50  ;;  %v2452_v50 = vand.u32 4294901760, %v673_v43  ;;  %v2454_v52 = vand.u32 4294901760, %v675_v48 }
  0xbd   :  { %v612_v57 = vpop.permute.xlu1 %611 }
  0xbe   :  { %v634_v60 = vmin.f32 %v626_v55, 0.0  ;;  %v623_v61 = vmul.f32 %v612_v57, %v2434_v45  ;;  %vm630_vm1 = vcmp.gt.f32.partialorder %v626_v55, 0.0 }
  0xc0   :  { %v638_v2 = vmul.f32 1.442695, %v634_v60  ;;  %v627_v9 = vadd.f32 %v623_v61, %v603_v59  ;;  %v2470_v59 = vsub.f32 %v675_v48, %v2454_v52 }
  0xc2   :  { %2256 = vpow2.f32 %v638_v2  ;;  %v635_v15 = vmin.f32 %v627_v9, 0.0  ;;  %v596_v16 = vpop.permute.xlu1 %595  ;;  %vm631_vm2 = vcmp.gt.f32.partialorder %v627_v9, 0.0 }
  0xc3   :  { %v601_v18 = vmul.f32 %v596_v16, %v2427_v38 }
  0xc4   :  { %v640_v22 = vmul.f32 1.442695, %v635_v15  ;;  %v770_v15 = vand.u32 4294901760, %v2470_v59 }
  0xc5   :  { %v605_v23 = vadd.f32 %v601_v18, %v581_v17 }
  0xc6   :  { %2258 = vpow2.f32 %v640_v22 }
  0xc7   :  { %v629_v25 = vadd.f32 %v625_v19, %v605_v23  ;;  %v616_v27 = vpop.permute.xlu1 %615  ;;  %v771_v23 = vsub.f32 %v2470_v59, %v770_v15 }
  0xc8   :  { %v624_v33 = vmul.f32 %v616_v27, %v2434_v45 }
  0xc9   :  { %v637_v28 = vmin.f32 %v629_v25, 0.0  ;;  %vm633_vm3 = vcmp.gt.f32.partialorder %v629_v25, 0.0 }
  0xca   :  { %v628_v34 = vadd.f32 %v624_v33, %v604_v29 }
  0xcb   :  { %v644_v35 = vmul.f32 1.442695, %v637_v28 }
  0xcc   :  { %v2257_v37 = vpop.eup %2256  ;;  %v636_v40 = vmin.f32 %v628_v34, 0.0  ;;  %vm632_vm4 = vcmp.gt.f32.partialorder %v628_v34, 0.0 }
  0xcd   :  { %v1844_v41 = vadd.f32 -1.0, %v2257_v37  ;;  %2260 = vpow2.f32 %v644_v35 }
  0xce   :  { %v642_v42 = vmul.f32 1.442695, %v636_v40 }
  0xcf   :  { %v650_v44 = vsel %vm630_vm1, %v626_v55, %v1844_v41  ;;  %v2461_v55 = vsub.f32 %v673_v43, %v2452_v50 }
  0xd0   :  { %v2259_v46 = vpop.eup %2258  ;;  %v680_v47 = vand.u32 4294901760, %v650_v44  ;;  %2262 = vpow2.f32 %v642_v42 }
  0xd1   :  { %v1845_v49 = vadd.f32 -1.0, %v2259_v46  ;;  %v760_v62 = vand.u32 4294901760, %v2461_v55 }
  0xd2   :  { %v2458_v54 = vsub.f32 %v650_v44, %v680_v47 }
  0xd3   :  { %v651_v51 = vsel %vm631_vm2, %v627_v9, %v1845_v49  ;;  %v2479_v9 = vsub.f32 %v677_v53, %v2467_v6  ;;  %v761_v19 = vsub.f32 %v2461_v55, %v760_v62 }
  0xd4   :  { %v683_v3 = vand.u32 4294901760, %v651_v51  ;;  %v791_v4 = vand.u32 4294901760, %v2458_v54 }
  0xd5   :  { %v780_v22 = vand.u32 4294901760, %v2479_v9  ;;  %v762_v28 = vand.u32 4294901760, %v761_v19 }
  0xd6   :  { %v2463_v56 = vpack.c.bf16 %v683_v3, %v680_v47  ;;  %v2465_v57 = vsub.f32 %v651_v51, %v683_v3  ;;  %v792_v16 = vsub.f32 %v2458_v54, %v791_v4  ;;  %v32_v3 = vld [vmem:[#allocation2 + $0x20] sm:$0xf] }
  0xd7   :  { %v2261_v58 = vpop.eup %2260  ;;  %v781_v37 = vsub.f32 %v2479_v9, %v780_v22  ;;  %143 = vperm.xlu0 %2251, %v32_v3  }
  0xd8   :  { %v1847_v60 = vadd.f32 -1.0, %v2261_v58  ;;  %2082 = vmatprep.subr.bf16.mxu0 %v2463_v56  ;;  %v798_v61 = vand.u32 4294901760, %v2465_v57  ;;  %v793_v33 = vand.u32 4294901760, %v792_v16  ;;  %v2097_v48 = vpack.c.bf16 %v2465_v57, %v2458_v54 }
  0xd9   :  { %2084 = vmatpush3.bf16.msra.mxu0 %v2463_v56  ;;  %v782_v43 = vand.u32 4294901760, %v781_v37  ;;  %v2326_v54 = vmov 0.0  }
  0xda   :  { %v2263_v63 = vpop.eup %2262  ;;  %v653_v1 = vsel %vm633_vm3, %v629_v25, %v1847_v60  ;;  %v799_v2 = vsub.f32 %v2465_v57, %v798_v61  ;;  %v2113_v51 = vpack.c.bf16 %v798_v61, %v791_v4  ;;  %2023 = vmatprep.mubr.msk.f32.mxu1 %vm2325_vm5, %v2326_v54 }
  0xdb   :  { %v689_v13 = vand.u32 4294901760, %v653_v1  ;;  %v1846_v14 = vadd.f32 -1.0, %v2263_v63  ;;  %2254 = vset.pattern.permute.xlu0 %v2322_v8 }
  0xdc   :  { %v800_v21 = vand.u32 4294901760, %v799_v2  ;;  %503 = vperm.xlu0 %2254, %v32_v3  }
  0xdd   :  { %v811_v17 = vsub.f32 %v653_v1, %v689_v13  ;;  %v652_v18 = vsel %vm632_vm4, %v628_v34, %v1846_v14  ;;  %v772_v34 = vand.u32 4294901760, %v771_v23 }
  0xde   :  { %v686_v20 = vand.u32 4294901760, %v652_v18  ;;  %v2089_v35 = vpack.c.bf16 %v800_v21, %v793_v33 }
  0xdf   :  { %v812_v25 = vand.u32 4294901760, %v811_v17 }
  0xe0   :  { %v2085_v27 = vpack.c.bf16 %v689_v13, %v686_v20  ;;  %v804_v29 = vsub.f32 %v652_v18, %v686_v20  ;;  %2255 = vset.pattern.permute.xlu0 %v2318_v0 }
  0xe1   :  { %v813_v41 = vsub.f32 %v811_v17, %v812_v25 }
  0xe2   :  { %2086 = vmatprep.subr.bf16.mxu0 %v2085_v27  ;;  %v805_v40 = vand.u32 4294901760, %v804_v29  ;;  %v2101_v49 = vpack.c.bf16 %v811_v17, %v804_v29 }
  0xe3   :  { %2088 = vmatpush3.bf16.msra.mxu0 %v2085_v27  ;;  %v814_v46 = vand.u32 4294901760, %v813_v41 }
  0xe4   :  { %2090 = vmatprep.subr.bf16.mxu0 %v2089_v35  ;;  %v806_v42 = vsub.f32 %v804_v29, %v805_v40  ;;  %v2117_v53 = vpack.c.bf16 %v812_v25, %v805_v40 }
  0xe6   :  { %1940 = vmatmul.mubr.f32.vlgmr.msra.gmra.mrb[0].mxu0 %v762_v28  ;;  %v807_v44 = vand.u32 4294901760, %v806_v42 }
  0xe7   :  { %2092 = vmatpush3.bf16.msra.mxu0 %v2089_v35  ;;  %1942 = vmatprep.mubr.f32.mxu0 %v772_v34 }
  0xe8   :  { %v2093_v47 = vpack.c.bf16 %v814_v46, %v807_v44 }
  0xea   :  { %1943 = vmatmul.mubr.f32.gmra.mrb[2].mxu0 %v782_v43  ;;  %2094 = vmatprep.subr.bf16.mxu0 %v2093_v47 }
  0xeb   :  { %2096 = vmatpush3.bf16.msra.mxu0 %v2093_v47  ;;  %1953 = vmatprep.mubr.f32.mxu0 %v2394_v10 }
  0xec   :  { %2098 = vmatprep.subr.bf16.mxu0 %v2097_v48 }
  0xee   :  { %1954 = vmatmul.mubr.f32.vlgmr.msra.gmra.mrb[0].mxu0 %v2452_v50 }
  0xef   :  { %2100 = vmatpush3.bf16.msra.mxu0 %v2097_v48  ;;  %1956 = vmatprep.mubr.f32.mxu0 %v2454_v52 }
  0xf0   :  { %2102 = vmatprep.subr.bf16.mxu0 %v2101_v49 }
  0xf2   :  { %1957 = vmatmul.mubr.f32.gmra.mrb[2].mxu0 %v2467_v6 }
  0xf3   :  { %2104 = vmatpush3.bf16.msra.mxu0 %v2101_v49  ;;  %1967 = vmatprep.mubr.f32.mxu0 %v2397_v11  ;;  %v31_v11 = vld [vmem:[#allocation2 + $0x20] sm:$0xff] }
  0xf4   :  { %2106 = vmatprep.subr.bf16.mxu0 %v2463_v56  ;;  %1319 = vperm.xlu1 %2250, %v31_v11  }
  0xf6   :  { %1968 = vmatmul.mubr.f32.vlgmr.msra.gmra.mrb[0].mxu0 %v2461_v55 }
  0xf7   :  { %2108 = vmatpush3.bf16.msra.mxu0 %v2463_v56  ;;  %1970 = vmatprep.mubr.f32.mxu0 %v2470_v59 }
  0xf8   :  { %2110 = vmatprep.subr.bf16.mxu0 %v2085_v27  ;;  %2252 = vset.pattern.permute.xlu1 %v2320_v5 }
  0xf9   :  { %263 = vperm.xlu1 %2252, %v32_v3  }
  0xfa   :  { %1971 = vmatmul.mubr.f32.gmra.mrb[2].mxu0 %v2479_v9  ;;  %v1322_v9 = vsel %vm670_vm0, %v31_v11, 0 }
  0xfb   :  { %2112 = vmatpush3.bf16.msra.mxu0 %v2085_v27  ;;  %1981 = vmatprep.mubr.f32.mxu0 %v750_v12  ;;  %v2324_v12 = vmov 0.0|0.0   ;;  %v2519_v13 = vand.u32 4294901760, %v1322_v9 }
  0xfc   :  { %2114 = vmatprep.subr.bf16.mxu0 %v2113_v51  ;;  %2129 = vmatprep.subr.bf16.mxu1 %v2324_v12 }
  0xfd   :  { %2253 = vset.pattern.permute.xlu1 %v2321_v7 }
  0xfe   :  { %1982 = vmatmul.mubr.f32.vlgmr.msra.gmra.mrb[0].mxu0 %v760_v62  ;;  %383 = vperm.xlu1 %2253, %v32_v3  }
  0xff   :  { %2116 = vmatpush3.bf16.msra.mxu0 %v2113_v51  ;;  %1984 = vmatprep.mubr.f32.mxu0 %v770_v15  ;;  %v2522_v15 = vsub.f32 %v1322_v9, %v2519_v13 }
 0x100   :  { %2118 = vmatprep.subr.bf16.mxu0 %v2117_v53 }
 0x101   :  { %v1395_v23 = vand.u32 4294901760, %v2522_v15 }
 0x102   :  { %1985 = vmatmul.mubr.f32.gmra.mrb[2].mxu0 %v780_v22 }
 0x103   :  { %2120 = vmatpush3.bf16.msra.mxu0 %v2117_v53  ;;  %1995 = vmatprep.mubr.f32.mxu0 %v2394_v10  ;;  %v1396_v43 = vsub.f32 %v2522_v15, %v1395_v23 }
 0x104   :  { %2122 = vmatprep.subr.bf16.mxu0 %v2463_v56 }
 0x106   :  { %1996 = vmatmul.mubr.f32.vlgmr.msra.gmra.mrb[0].mxu0 %v2452_v50 }
 0x107   :  { %2124 = vmatpush3.bf16.msra.mxu0 %v2463_v56  ;;  %1998 = vmatprep.mubr.f32.mxu0 %v2454_v52 }
 0x108   :  { %2126 = vmatprep.subr.bf16.mxu0 %v2085_v27 }
 0x10a   :  { %1999 = vmatmul.mubr.f32.gmra.mrb[2].mxu0 %v2467_v6 }
 0x10b   :  { %2128 = vmatpush3.bf16.msra.mxu0 %v2085_v27  ;;  %2009 = vmatprep.mubr.f32.mxu0 %v2394_v10  ;;  %v656_v10 = vpop.permute.xlu1 %655 }
 0x10e   :  { %2010 = vmatmul.mubr.f32.vlgmr.msra.gmra.mrb[0].mxu0 %v2452_v50 }
 0x10f   :  { %2012 = vmatprep.mubr.f32.mxu0 %v2454_v52  ;;  %v660_v50 = vpop.permute.xlu1 %659 }
 0x112   :  { %2013 = vmatmul.mubr.f32.gmra.mrb[2].mxu0 %v2467_v6  ;;  %v664_v6 = vpop.permute.xlu0 %663 }
 0x113   :  { %v668_v58 = vpop.permute.xlu1 %667 }
 0x1e1   :  { %v2011_v52 = vpop.f32.mrb[0].mxu0 }
 0x1e2   :  { %v2165_v5 = vadd.f32 %v2011_v52, %v660_v50  ;;  %v1271_v55 = vpop.f32.mrb[1].mxu0  ;;  %v1397_v50 = vand.u32 4294901760, %v1396_v43  ;;  %v2330_v43 = vmov 2475754826  }
 0x1e3   :  { %v2166_v56 = vadd.f32 %v1271_v55, %v656_v10 }
 0x1e4   :  { %v1298_v57 = vmin.f32 %v2165_v5, 0.0  ;;  %vm1294_vm6 = vcmp.gt.f32.partialorder %v2165_v5, 0.0 }
 0x1e5   :  { %v1297_v59 = vmin.f32 %v2166_v56, 0.0  ;;  %v2014_v60 = vpop.f32.mrb[2].mxu0  ;;  %vm1293_vm7 = vcmp.gt.f32.partialorder %v2166_v56, 0.0 }
 0x1e6   :  { %v1303_v4 = vmul.f32 1.442695, %v1298_v57  ;;  %v2167_v61 = vadd.f32 %v2014_v60, %v668_v58  ;;  %v1283_v7 = vpop.f32.mrb[3].mxu0 }
 0x1e7   :  { %v1301_v62 = vmul.f32 1.442695, %v1297_v59  ;;  %v2168_v8 = vadd.f32 %v1283_v7, %v664_v6  ;;  %v25_v7 = vld [vmem:[%s2973_s0] sm:$0xf] }
 0x1e8   :  { %2264 = vpow2.f32 %v1303_v4  ;;  %v1300_v63 = vmin.f32 %v2167_v61, 0.0  ;;  %vm1296_vm8 = vcmp.gt.f32.partialorder %v2167_v61, 0.0 }
 0x1e9   :  { %2266 = vpow2.f32 %v1301_v62  ;;  %v1299_v0 = vmin.f32 %v2168_v8, 0.0  ;;  %vm1295_vm9 = vcmp.gt.f32.partialorder %v2168_v8, 0.0  ;;  %v157_v62 = vrot.slane %v25_v7, %v156_v31 }
 0x1ea   :  { %v1307_v1 = vmul.f32 1.442695, %v1300_v63  ;;  %v36_v63 = vrot.slane %v25_v7, %v35_v26  ;;  %v397_v26 = vrot.slane %v25_v7, %v396_v39 }
 0x1eb   :  { %v1305_v2 = vmul.f32 1.442695, %v1299_v0 }
 0x1ec   :  { %2268 = vpow2.f32 %v1307_v1  ;;  %v277_v1 = vrot.slane %v25_v7, %v276_v32 }
 0x1ed   :  { %2270 = vpow2.f32 %v1305_v2 }
 0x1f2   :  { %v2265_v14 = vpop.eup %2264 }
 0x1f3   :  { %v2267_v16 = vpop.eup %2266  ;;  %v1849_v17 = vadd.f32 -1.0, %v2265_v14 }
 0x1f4   :  { %v1848_v18 = vadd.f32 -1.0, %v2267_v16 }
 0x1f5   :  { %v1314_v19 = vsel %vm1294_vm6, %v2165_v5, %v1849_v17 }
 0x1f6   :  { %v2269_v20 = vpop.eup %2268  ;;  %v1328_v21 = vand.u32 4294901760, %v1314_v19  ;;  %v1313_v22 = vsel %vm1293_vm7, %v2166_v56, %v1848_v18  ;;  %v2571_v18 = vsub.f32 %v25_v7, %v397_v26 }
 0x1f7   :  { %v2271_v25 = vpop.eup %2270  ;;  %v1325_v27 = vand.u32 4294901760, %v1313_v22  ;;  %v1851_v29 = vadd.f32 -1.0, %v2269_v20 }
 0x1f8   :  { %v1412_v33 = vsub.f32 %v1314_v19, %v1328_v21  ;;  %v1850_v28 = vadd.f32 -1.0, %v2271_v25 }
 0x1f9   :  { %v1405_v35 = vsub.f32 %v1313_v22, %v1325_v27  ;;  %v1316_v37 = vsel %vm1296_vm8, %v2167_v61, %v1851_v29  ;;  %v2130_v40 = vpack.c.bf16 %v1328_v21, %v1325_v27  ;;  %v402_v21 = vand.u32 2139095040, %v2571_v18 }
 0x1fa   :  { %v1413_v41 = vand.u32 4294901760, %v1412_v33  ;;  %v1334_v34 = vand.u32 4294901760, %v1316_v37  ;;  %v1315_v42 = vsel %vm1295_vm9, %v2168_v8, %v1850_v28  ;;  %v2556_v8 = vsub.f32 %v25_v7, %v157_v62 }
 0x1fb   :  { %v1406_v44 = vand.u32 4294901760, %v1405_v35  ;;  %v1331_v46 = vand.u32 4294901760, %v1315_v42  ;;  %2131 = vmatpush3.bf16.msra.mxu1 %v2130_v40  ;;  %v2142_v47 = vpack.c.bf16 %v1412_v33, %v1405_v35  ;;  %v403_v25 = vshrl.u32 %v402_v21, 23 }
 0x1fc   :  { %v1426_v48 = vsub.f32 %v1316_v37, %v1334_v34  ;;  %2132 = vmatprep.subr.bf16.mxu1 %v2324_v12  ;;  %v1414_v49 = vsub.f32 %v1412_v33, %v1413_v41  ;;  %v162_v0 = vand.u32 2139095040, %v2556_v8  ;;  %v159_v33 = vand.u32 2147483647, %v2556_v8 }
 0x1fd   :  { %v1419_v51 = vsub.f32 %v1315_v42, %v1331_v46  ;;  %v2133_v53 = vpack.c.bf16 %v1334_v34, %v1331_v46  ;;  %v1407_v11 = vsub.f32 %v1405_v35, %v1406_v44  ;;  %v2154_v3 = vpack.c.bf16 %v1413_v41, %v1406_v44 }
 0x1fe   :  { %v1427_v10 = vand.u32 4294901760, %v1426_v48  ;;  %v1415_v52 = vand.u32 4294901760, %v1414_v49  ;;  %v1840_v39 = vadd.s32 4294967169, %v403_v25  ;;  %v2327_v35 = vmov 2102212464  }
 0x1ff   :  { %v1420_v5 = vand.u32 4294901760, %v1419_v51  ;;  %2134 = vmatpush3.bf16.msra.mxu1 %v2133_v53  ;;  %v1408_v55 = vand.u32 4294901760, %v1407_v11  ;;  %v2145_v56 = vpack.c.bf16 %v1426_v48, %v1419_v51  ;;  %v2329_v34 = vmov 683565275  }
 0x200   :  { %2135 = vmatprep.subr.bf16.mxu1 %v2324_v12  ;;  %v1428_v57 = vsub.f32 %v1426_v48, %v1427_v10  ;;  %v166_v49 = vand.u32 8388607, %v159_v33 }
 0x201   :  { %v2136_v6 = vpack.c.bf16 %v1415_v52, %v1408_v55  ;;  %v1421_v58 = vsub.f32 %v1419_v51, %v1420_v5  ;;  %v2157_v59 = vpack.c.bf16 %v1427_v10, %v1420_v5  ;;  %v409_v5 = vadd.s32 1, %v1840_v39 }
 0x202   :  { %2024 = vmatmul.mubr.f32.vlgmr.msra.gmra.mrb[0].mxu1 %v1397_v50  ;;  %v1429_v60 = vand.u32 4294901760, %v1428_v57 }
 0x203   :  { %2137 = vmatpush3.bf16.msra.mxu1 %v2136_v6  ;;  %v1422_v4 = vand.u32 4294901760, %v1421_v58  ;;  %2034 = vmatprep.mubr.msk.f32.mxu1 %vm2325_vm5, %v2326_v54  ;;  %v167_v6 = vor.u32 8388608, %v166_v49  ;;  %vm410_vm0 = vcmp.gt.s32.totalorder %v409_v5, 0 }
 0x204   :  { %2138 = vmatprep.subr.bf16.mxu1 %v2324_v12 }
 0x205   :  { %v2139_v61 = vpack.c.bf16 %v1429_v60, %v1422_v4 }
 0x207   :  { %2140 = vmatpush3.bf16.msra.mxu1 %v2139_v61 }
 0x208   :  { %2141 = vmatprep.subr.bf16.mxu1 %v2324_v12 }
 0x20a   :  { %2035 = vmatmul.mubr.f32.vlgmr.msra.gmra.mrb[0].mxu1 %v2519_v13 }
 0x20b   :  { %2143 = vmatpush3.bf16.msra.mxu1 %v2142_v47  ;;  %2045 = vmatprep.mubr.msk.f32.mxu1 %vm2325_vm5, %v2326_v54  ;;  %v2331_v47 = vmov 2131351028  }
 0x20c   :  { %2144 = vmatprep.subr.bf16.mxu1 %v2324_v12 }
 0x20f   :  { %2146 = vmatpush3.bf16.msra.mxu1 %v2145_v56 }
 0x210   :  { %2147 = vmatprep.subr.bf16.mxu1 %v2324_v12 }
 0x212   :  { %2046 = vmatmul.mubr.f32.vlgmr.msra.gmra.mrb[0].mxu1 %v2522_v15 }
 0x213   :  { %2149 = vmatpush3.bf16.msra.mxu1 %v2130_v40  ;;  %2056 = vmatprep.mubr.msk.f32.mxu1 %vm2325_vm5, %v2326_v54 }
 0x214   :  { %2150 = vmatprep.subr.bf16.mxu1 %v2324_v12 }
 0x217   :  { %2152 = vmatpush3.bf16.msra.mxu1 %v2133_v53 }
 0x218   :  { %2153 = vmatprep.subr.bf16.mxu1 %v2324_v12 }
 0x21a   :  { %2057 = vmatmul.mubr.f32.vlgmr.msra.gmra.mrb[0].mxu1 %v1395_v23 }
 0x21b   :  { %2155 = vmatpush3.bf16.msra.mxu1 %v2154_v3  ;;  %2067 = vmatprep.mubr.msk.f32.mxu1 %vm2325_vm5, %v2326_v54  ;;  %v2332_v3 = vmov 1326507024  }
 0x21c   :  { %2156 = vmatprep.subr.bf16.mxu1 %v2324_v12 }
 0x21f   :  { %2158 = vmatpush3.bf16.msra.mxu1 %v2157_v59 }
 0x220   :  { %2159 = vmatprep.subr.bf16.mxu1 %v2324_v12 }
 0x222   :  { %2068 = vmatmul.mubr.f32.vlgmr.msra.gmra.mrb[0].mxu1 %v2519_v13 }
 0x223   :  { %2161 = vmatpush3.bf16.msra.mxu1 %v2130_v40  ;;  %2078 = vmatprep.mubr.msk.f32.mxu1 %vm2325_vm5, %v2326_v54  ;;  %v2561_v54 = vsub.f32 %v25_v7, %v36_v63  ;;  %v2328_v40 = vmov 920167782  }
 0x224   :  { %2162 = vmatprep.subr.bf16.mxu1 %v2324_v12  ;;  %v163_v12 = vshrl.u32 %v162_v0, 23  ;;  %v2601_v0 = vshll.u32 %v167_v6, 8 }
 0x225   :  { %v41_v2 = vand.u32 2139095040, %v2561_v54 }
 0x226   :  { %v1832_v9 = vadd.s32 4294967169, %v163_v12  ;;  %v38_v12 = vand.u32 2147483647, %v2561_v54 }
 0x227   :  { %2164 = vmatpush3.bf16.msra.mxu1 %v2133_v53  ;;  %v42_v14 = vshrl.u32 %v41_v2, 23 }
 0x228   :  { %v169_v31 = vadd.s32 1, %v1832_v9 }
 0x229   :  { %v1828_v16 = vadd.s32 4294967169, %v42_v14 }
 0x22a   :  { %2079 = vmatmul.mubr.f32.vlgmr.msra.gmra.mrb[0].mxu1 %v2519_v13  ;;  %v2566_v13 = vsub.f32 %v25_v7, %v277_v1  ;;  %vm170_vm10 = vcmp.gt.s32.totalorder %v169_v31, 0 }
 0x22b   :  { %v171_v19 = vsel %vm170_vm10, %v169_v31, 0  ;;  %v48_v20 = vadd.s32 1, %v1828_v16 }
 0x22c   :  { %v282_v15 = vand.u32 2139095040, %v2566_v13  ;;  %v173_v22 = vand.u32 31, %v171_v19  ;;  %v2575_v28 = vshrl.u32 %v171_v19, 5 }
 0x22d   :  { %vm49_vm11 = vcmp.gt.s32.totalorder %v48_v20, 0 }
 0x22e   :  { %v283_v17 = vshrl.u32 %v282_v15, 23  ;;  %v174_v27 = vsub.s32 32, %v173_v22  ;;  %v50_v29 = vsel %vm49_vm11, %v48_v20, 0  ;;  %v185_v37 = vshll.u32 %v2327_v35, %v173_v22 }
 0x22f   :  { %v52_v24 = vand.u32 31, %v50_v29  ;;  %v176_v42 = vshll.u32 %v2329_v34, %v173_v22  ;;  %v179_v46 = vshll.u32 %v2330_v43, %v173_v22  ;;  %v182_v51 = vshll.u32 %v2331_v47, %v173_v22 }
 0x230   :  { %v1836_v32 = vadd.s32 4294967169, %v283_v17  ;;  %v186_v41 = vshrl.u32 %v2328_v40, %v174_v27  ;;  %v177_v44 = vshrl.u32 %v2330_v43, %v174_v27  ;;  %v180_v48 = vshrl.u32 %v2331_v47, %v174_v27 }
 0x231   :  { %v183_v53 = vshrl.u32 %v2327_v35, %v174_v27  ;;  %v188_v11 = vshll.u32 %v2328_v40, %v173_v22  ;;  %v189_v10 = vshrl.u32 %v2332_v3, %v174_v27  ;;  %vm194_vm13 = vcmp.lt.s32.totalorder %v2575_v28, 4 }
 0x232   :  { %v289_v23 = vadd.s32 1, %v1836_v32  ;;  %v187_v50 = vor.u32 %v186_v41, %v185_v37  ;;  %v178_v55 = vor.u32 %v177_v44, %v176_v42  ;;  %v181_v56 = vor.u32 %v180_v48, %v179_v46 }
 0x233   :  { %v53_v57 = vsub.s32 32, %v52_v24  ;;  %vm191_vm14 = vcmp.lt.s32.totalorder %v2575_v28, 1  ;;  %v184_v58 = vor.u32 %v183_v53, %v182_v51  ;;  %v190_v59 = vor.u32 %v189_v10, %v188_v11 }
 0x234   :  { %vm290_vm12 = vcmp.gt.s32.totalorder %v289_v23, 0  ;;  %vm193_vm15 = vcmp.lt.s32.totalorder %v2575_v28, 3  ;;  %v200_v60 = vsel %vm194_vm13, %v187_v50, 920167782  ;;  %vm192_vm1 = vcmp.lt.s32.totalorder %v2575_v28, 2 }
 0x235   :  { %v291_v52 = vsel %vm290_vm12, %v289_v23, 0  ;;  %v199_v61 = vsel %vm191_vm14, %v178_v55, %v181_v56  ;;  %v64_v7 = vshll.u32 %v2327_v35, %v52_v24  ;;  %v65_v62 = vshrl.u32 %v2328_v40, %v53_v57 }
 0x236   :  { %v293_v4 = vand.u32 31, %v291_v52  ;;  %v175_v63 = vshrl.u32 %v2329_v34, %v174_v27  ;;  %v2604_v1 = vshrl.u32 %v50_v29, 5  ;;  %v201_v2 = vsel %vm193_vm15, %v184_v58, %v200_v60 }
 0x237   :  { %v204_v9 = vsel %vm194_vm13, %v190_v59, 1326507024  ;;  %v55_v14 = vshll.u32 %v2329_v34, %v52_v24  ;;  %v56_v31 = vshrl.u32 %v2330_v43, %v53_v57  ;;  %v58_v15 = vshll.u32 %v2330_v43, %v52_v24 }
 0x238   :  { %v59_v26 = vshrl.u32 %v2331_v47, %v53_v57  ;;  %v61_v16 = vshll.u32 %v2331_v47, %v52_v24  ;;  %v62_v17 = vshrl.u32 %v2327_v35, %v53_v57  ;;  %v203_v19 = vsel %vm191_vm14, %v181_v56, %v184_v58 }
 0x239   :  { %v66_v20 = vor.u32 %v65_v62, %v64_v7  ;;  %v67_v32 = vshll.u32 %v2328_v40, %v52_v24  ;;  %v68_v21 = vshrl.u32 %v2332_v3, %v53_v57  ;;  %v196_v22 = vsel %vm194_vm13, %v184_v58, 2102212464 }
 0x23a   :  { %v45_v23 = vand.u32 8388607, %v38_v12  ;;  %v2625_v25 = vshrl.u32 %v2329_v34, %v53_v57  ;;  %vm73_vm2 = vcmp.lt.s32.totalorder %v2604_v1, 4  ;;  %v2630_v27 = vsel %vm191_vm14, %v175_v63, %v178_v55 }
 0x23b   :  { %v2634_v29 = vsel %vm192_vm1, %v199_v61, %v201_v2  ;;  %v205_v24 = vsel %vm193_vm15, %v187_v50, %v204_v9  ;;  %v2638_v39 = vsub.s32 32, %v293_v4  ;;  %v2640_v37 = vor.u32 %v56_v31, %v55_v14 }
 0x23c   :  { %v2642_v41 = vor.u32 %v59_v26, %v58_v15  ;;  %v2644_v42 = vor.u32 %v62_v17, %v61_v16  ;;  %vm70_vm3 = vcmp.lt.s32.totalorder %v2604_v1, 1  ;;  %v69_v44 = vor.u32 %v68_v21, %v67_v32 }
 0x23d   :  { %vm72_vm4 = vcmp.lt.s32.totalorder %v2604_v1, 3  ;;  %v79_v46 = vsel %vm73_vm2, %v66_v20, 920167782  ;;  %v411_v48 = vsel %vm410_vm0, %v409_v5, 0  ;;  %v2653_v49 = vsel %vm193_vm15, %v181_v56, %v196_v22 }
 0x23e   :  { %v2657_v51 = vsel %vm192_vm1, %v203_v19, %v205_v24  ;;  %v46_v53 = vor.u32 8388608, %v45_v23  ;;  %vm71_vm5 = vcmp.lt.s32.totalorder %v2604_v1, 2  ;;  %v305_v11 = vshll.u32 %v2327_v35, %v293_v4 }
 0x23f   :  { %v306_v10 = vshrl.u32 %v2328_v40, %v2638_v39  ;;  %v308_v50 = vshll.u32 %v2328_v40, %v293_v4  ;;  %v309_v5 = vshrl.u32 %v2332_v3, %v2638_v39  ;;  %v78_v55 = vsel %vm70_vm3, %v2640_v37, %v2642_v41 }
 0x240   :  { %v80_v56 = vsel %vm72_vm4, %v2644_v42, %v79_v46  ;;  %v2673_v57 = vshrl.u32 %v291_v52, 5  ;;  %v413_v6 = vand.u32 31, %v411_v48  ;;  %v83_v58 = vsel %vm73_vm2, %v69_v44, 1326507024 }
 0x241   :  { %v279_v59 = vand.u32 2147483647, %v2566_v13  ;;  %v296_v60 = vshll.u32 %v2329_v34, %v293_v4  ;;  %v299_v61 = vshll.u32 %v2330_v43, %v293_v4  ;;  %v297_v7 = vshrl.u32 %v2330_v43, %v2638_v39 }
 0x242   :  { %v300_v62 = vshrl.u32 %v2331_v47, %v2638_v39  ;;  %v302_v63 = vshll.u32 %v2331_v47, %v293_v4  ;;  %v303_v52 = vshrl.u32 %v2327_v35, %v2638_v39  ;;  %v307_v14 = vor.u32 %v306_v10, %v305_v11 }
 0x243   :  { %v2689_v2 = vmul.u32.u64.low %v2601_v0, %v2657_v51  ;;  %v2690_v9 = vmul.u32.u64.high %v2601_v0, %v2657_v51, %v2689_v2  ;;  %v310_v31 = vor.u32 %v309_v5, %v308_v50  ;;  %vm314_vm6 = vcmp.lt.s32.totalorder %v2673_v57, 4 }
 0x244   :  { %v2695_v15 = vmul.u32.u64.low %v2601_v0, %v2634_v29  ;;  %v2696_v26 = vmul.u32.u64.high %v2601_v0, %v2634_v29, %v2695_v15  ;;  %v2700_v4 = vsub.s32 32, %v413_v6  ;;  %v81_v16 = vsel %vm71_vm5, %v78_v55, %v80_v56 }
 0x245   :  { %v82_v17 = vsel %vm70_vm3, %v2642_v41, %v2644_v42  ;;  %v84_v19 = vsel %vm72_vm4, %v66_v20, %v83_v58  ;;  %v2710_v32 = vshll.u32 %v46_v53, 8  ;;  %v286_v21 = vand.u32 8388607, %v279_v59 }
 0x246   :  { %v2714_v22 = vor.u32 %v297_v7, %v296_v60  ;;  %v2716_v23 = vor.u32 %v300_v62, %v299_v61  ;;  %v304_v29 = vor.u32 %v303_v52, %v302_v63  ;;  %vm311_vm7 = vcmp.lt.s32.totalorder %v2673_v57, 1 }
 0x247   :  { %vm313_vm8 = vcmp.lt.s32.totalorder %v2673_v57, 3  ;;  %v320_v24 = vsel %vm314_vm6, %v307_v14, 920167782  ;;  %v324_v20 = vsel %vm314_vm6, %v310_v31, 1326507024  ;;  %v2725_v46 = vshrl.u32 %v411_v48, 5 }
 0x248   :  { %v399_v44 = vand.u32 2147483647, %v2571_v18  ;;  %v425_v51 = vshll.u32 %v2327_v35, %v413_v6  ;;  %v426_v53 = vshrl.u32 %v2328_v40, %v2700_v4  ;;  %v416_v11 = vshll.u32 %v2329_v34, %v413_v6 }
 0x249   :  { %v417_v10 = vshrl.u32 %v2330_v43, %v2700_v4  ;;  %v419_v50 = vshll.u32 %v2330_v43, %v413_v6  ;;  %v420_v5 = vshrl.u32 %v2331_v47, %v2700_v4  ;;  %v422_v55 = vshll.u32 %v2331_v47, %v413_v6 }
 0x24a   :  { %v423_v48 = vshrl.u32 %v2327_v35, %v2700_v4  ;;  %v428_v56 = vshll.u32 %v2328_v40, %v413_v6  ;;  %v429_v58 = vshrl.u32 %v2332_v3, %v2700_v4  ;;  %v85_v60 = vsel %vm71_vm5, %v82_v17, %v84_v19 }
 0x24b   :  { %v2745_v61 = vmul.u32.u64.low %v2710_v32, %v81_v16  ;;  %v2746_v7 = vmul.u32.u64.high %v2710_v32, %v81_v16, %v2745_v61  ;;  %v287_v43 = vor.u32 8388608, %v286_v21  ;;  %vm312_vm9 = vcmp.lt.s32.totalorder %v2673_v57, 2 }
 0x24c   :  { %v319_v35 = vsel %vm311_vm7, %v2714_v22, %v2716_v23  ;;  %v406_v40 = vand.u32 8388607, %v399_v44  ;;  %v427_v47 = vor.u32 %v426_v53, %v425_v51  ;;  %v321_v3 = vsel %vm313_vm8, %v304_v29, %v320_v24 }
 0x24d   :  { %v323_v6 = vsel %vm311_vm7, %v2716_v23, %v304_v29  ;;  %v325_v62 = vsel %vm313_vm8, %v307_v14, %v324_v20  ;;  %vm434_vm10 = vcmp.lt.s32.totalorder %v2725_v46, 4  ;;  %v418_v63 = vor.u32 %v417_v10, %v416_v11 }
 0x24e   :  { %v421_v52 = vor.u32 %v420_v5, %v419_v50  ;;  %v424_v2 = vor.u32 %v423_v48, %v422_v55  ;;  %v430_v31 = vor.u32 %v429_v58, %v428_v56  ;;  %vm431_vm11 = vcmp.lt.s32.totalorder %v2725_v46, 1 }
 0x24f   :  { %v2765_v16 = vmul.u32.u64.low %v2710_v32, %v85_v60  ;;  %v2766_v17 = vmul.u32.u64.high %v2710_v32, %v85_v60, %v2765_v16  ;;  %vm433_vm12 = vcmp.lt.s32.totalorder %v2725_v46, 3  ;;  %v75_v19 = vsel %vm73_vm2, %v2644_v42, 2102212464 }
 0x250   :  { %v327_v21 = vshll.u32 %v287_v43, 8  ;;  %v407_v14 = vor.u32 8388608, %v406_v40  ;;  %v440_v24 = vsel %vm434_vm10, %v427_v47, 920167782  ;;  %v198_v20 = vsel %vm192_vm1, %v2630_v27, %v2653_v49 }
 0x251   :  { %v322_v51 = vsel %vm312_vm9, %v319_v35, %v321_v3  ;;  %v326_v53 = vsel %vm312_vm9, %v323_v6, %v325_v62  ;;  %vm432_vm13 = vcmp.lt.s32.totalorder %v2725_v46, 2  ;;  %v439_v42 = vsel %vm431_vm11, %v418_v63, %v421_v52 }
 0x252   :  { %v441_v11 = vsel %vm433_vm12, %v424_v2, %v440_v24  ;;  %v444_v10 = vsel %vm434_vm10, %v430_v31, 1326507024  ;;  %v74_v28 = vsel %vm70_vm3, %v2625_v25, %v2640_v37  ;;  %v76_v27 = vsel %vm72_vm4, %v2642_v41, %v75_v19 }
 0x253   :  { %v295_v49 = vshrl.u32 %v2329_v34, %v2638_v39  ;;  %v443_v50 = vsel %vm431_vm11, %v421_v52, %v424_v2  ;;  %v2801_v5 = vmul.u32.u64.low %v327_v21, %v322_v51  ;;  %v2802_v55 = vmul.u32.u64.high %v327_v21, %v322_v51, %v2801_v5 }
 0x254   :  { %v445_v48 = vsel %vm433_vm12, %v427_v47, %v444_v10  ;;  %v447_v56 = vshll.u32 %v407_v14, 8  ;;  %v2807_v58 = vmul.u32.u64.low %v327_v21, %v326_v53  ;;  %v2808_v25 = vmul.u32.u64.high %v327_v21, %v326_v53, %v2807_v58 }
 0x255   :  { %v442_v37 = vsel %vm432_vm13, %v439_v42, %v441_v11  ;;  %v217_v41 = vadd.s32 1, %v2696_v26  ;;  %v316_v39 = vsel %vm314_vm6, %v304_v29, 2102212464  ;;  %v446_v60 = vsel %vm432_vm13, %v443_v50, %v445_v48 }
 0x256   :  { %v214_v43 = vmul.u32 %v2601_v0, %v198_v20  ;;  %vm216_vm14 = vc.u32 %v2690_v9, %v2695_v15  ;;  %v77_v35 = vsel %vm71_vm5, %v74_v28, %v76_v27  ;;  %v96_v40 = vadd.s32 1, %v2746_v7 }
 0x257   :  { %vm95_vm15 = vc.u32 %v2766_v17, %v2745_v61  ;;  %v315_v29 = vsel %vm311_vm7, %v295_v49, %v2714_v22  ;;  %v2828_v47 = vmul.u32.u64.low %v447_v56, %v442_v37  ;;  %v2829_v3 = vmul.u32.u64.high %v447_v56, %v442_v37, %v2828_v47 }
 0x258   :  { %v317_v0 = vsel %vm313_vm8, %v2716_v23, %v316_v39  ;;  %v415_v1 = vshrl.u32 %v2329_v34, %v2700_v4  ;;  %v2837_v6 = vmul.u32.u64.low %v447_v56, %v446_v60  ;;  %v2838_v62 = vmul.u32.u64.high %v447_v56, %v446_v60, %v2837_v6 }
 0x259   :  { %v218_v31 = vsel %vm216_vm14, %v217_v41, %v2696_v26  ;;  %v93_v16 = vmul.u32 %v2710_v32, %v77_v35  ;;  %v436_v22 = vsel %vm434_vm10, %v424_v2, 2102212464  ;;  %v97_v19 = vsel %vm95_vm15, %v96_v40, %v2746_v7 }
 0x25a   :  { %v318_v14 = vsel %vm312_vm9, %v315_v29, %v317_v0  ;;  %v337_v23 = vadd.s32 1, %v2802_v55  ;;  %v219_v24 = vadd.s32 %v218_v31, %v214_v43  ;;  %vm336_vm0 = vc.u32 %v2808_v25, %v2801_v5 }
 0x25b   :  { %v435_v34 = vsel %vm431_vm11, %v415_v1, %v418_v63  ;;  %v437_v26 = vsel %vm433_vm12, %v421_v52, %v436_v22  ;;  %v98_v4 = vadd.s32 %v97_v19, %v93_v16  ;;  %v334_v32 = vmul.u32 %v327_v21, %v318_v14 }
 0x25c   :  { %v338_v2 = vsel %vm336_vm0, %v337_v23, %v2802_v55  ;;  %v438_v57 = vsel %vm432_vm13, %v435_v34, %v437_v26  ;;  %v457_v7 = vadd.s32 1, %v2829_v3  ;;  %v220_v20 = vadd.s32 536870912, %v219_v24 }
 0x25d   :  { %vm456_vm1 = vc.u32 %v2838_v62, %v2828_v47  ;;  %v99_v51 = vadd.s32 536870912, %v98_v4  ;;  %v339_v53 = vadd.s32 %v338_v2, %v334_v32  ;;  %v454_v42 = vmul.u32 %v447_v56, %v438_v57 }
 0x25e   :  { %v458_v63 = vsel %vm456_vm1, %v457_v7, %v2829_v3  ;;  %v2861_v11 = vshrl.u32 %v220_v20, 30  ;;  %v215_v2 = vadd.s32 %v2695_v15, %v2690_v9  ;;  %v94_v20 = vadd.s32 %v2745_v61, %v2766_v17 }
 0x25f   :  { %v2863_v52 = vshrl.u32 %v99_v51, 30  ;;  %v340_v21 = vadd.s32 536870912, %v339_v53  ;;  %v459_v10 = vadd.s32 %v458_v63, %v454_v42  ;;  %vm161_vm6 = vcmp.lt.s32.totalorder %v2556_v8, 0 }
 0x260   :  { %v222_v46 = vshll.u32 %v2861_v11, 30  ;;  %vm40_vm7 = vcmp.lt.s32.totalorder %v2561_v54, 0  ;;  %vm2890_vm8 = vcmp.le.f32.partialorder %v159_v33, 0.7853982  ;;  %vm2898_vm9 = vcmp.le.f32.partialorder %v38_v12, 0.7853982 }
 0x261   :  { %v101_v28 = vshll.u32 %v2863_v52, 30  ;;  %v2867_v27 = vshrl.u32 %v340_v21, 30  ;;  %v460_v49 = vadd.s32 536870912, %v459_v10  ;;  %vm281_vm10 = vcmp.lt.s32.totalorder %v2566_v13, 0 }
 0x262   :  { %v223_v50 = vsub.s32 %v219_v24, %v222_v46  ;;  %vm2913_vm11 = vcmp.le.f32.partialorder %v279_v59, 0.7853982  ;;  %vm401_vm12 = vcmp.lt.s32.totalorder %v2571_v18, 0  ;;  %vm2927_vm13 = vcmp.le.f32.partialorder %v399_v44, 0.7853982 }
 0x263   :  { %v102_v55 = vsub.s32 %v98_v4, %v101_v28  ;;  %v342_v48 = vshll.u32 %v2867_v27, 30  ;;  %v2870_v56 = vshrl.u32 %v460_v49, 30  ;;  %v335_v28 = vadd.s32 %v2801_v5, %v2808_v25 }
 0x264   :  { %v225_v58 = vsub.s32 0, %v223_v50 }
 0x265   :  { %v104_v37 = vsub.s32 0, %v102_v55  ;;  %v343_v41 = vsub.s32 %v339_v53, %v342_v48  ;;  %v462_v39 = vshll.u32 %v2870_v56, 30 }
 0x266   :  { %v1833_v60 = vmin.u32 %v225_v58, %v223_v50 }
 0x267   :  { %v1829_v43 = vmin.u32 %v104_v37, %v102_v55  ;;  %v345_v35 = vsub.s32 0, %v343_v41  ;;  %v2873_v40 = vsub.s32 %v459_v10, %v462_v39 }
 0x268   :  { %v227_v29 = vclz %v1833_v60 }
 0x269   :  { %v106_v3 = vclz %v1829_v43  ;;  %v1837_v0 = vmin.u32 %v345_v35, %v343_v41  ;;  %v465_v1 = vsub.s32 0, %v2873_v40 }
 0x26a   :  { %v1834_v6 = vadd.s32 4294967294, %v227_v29 }
 0x26b   :  { %v1830_v31 = vadd.s32 4294967294, %v106_v3  ;;  %v347_v16 = vclz %v1837_v0  ;;  %v1841_v22 = vmin.u32 %v465_v1, %v2873_v40 }
 0x26c   :  { %vm1835_vm2 = vcmp.lt.s32.totalorder %v1834_v6, 0 }
 0x26d   :  { %vm1831_vm3 = vcmp.lt.s32.totalorder %v1830_v31, 0  ;;  %v1838_v19 = vadd.s32 4294967294, %v347_v16  ;;  %v467_v14 = vclz %v1841_v22  ;;  %v230_v23 = vsel %vm1835_vm2, 0, %v1834_v6 }
 0x26e   :  { %v109_v24 = vsel %vm1831_vm3, 0, %v1830_v31  ;;  %v235_v34 = vsub.s32 4294967266, %v230_v23  ;;  %v231_v57 = vsub.s32 32, %v230_v23  ;;  %v232_v21 = vshll.u32 %v223_v50, %v230_v23 }
 0x26f   :  { %vm1839_vm4 = vcmp.lt.s32.totalorder %v1838_v19, 0  ;;  %v1842_v26 = vadd.s32 4294967294, %v467_v14  ;;  %v114_v4 = vsub.s32 4294967266, %v109_v24  ;;  %v110_v51 = vsub.s32 32, %v109_v24 }
 0x270   :  { %v350_v32 = vsel %vm1839_vm4, 0, %v1838_v19  ;;  %v236_v7 = vadd.s32 127, %v235_v34  ;;  %v233_v10 = vshrl.u32 %v215_v2, %v231_v57  ;;  %v111_v49 = vshll.u32 %v102_v55, %v109_v24 }
 0x271   :  { %vm1843_vm5 = vcmp.lt.s32.totalorder %v1842_v26, 0  ;;  %v115_v53 = vadd.s32 127, %v114_v4  ;;  %v355_v42 = vsub.s32 4294967266, %v350_v32  ;;  %v112_v48 = vshrl.u32 %v94_v20, %v110_v51 }
 0x272   :  { %v470_v63 = vsel %vm1843_vm5, 0, %v1842_v26  ;;  %v237_v46 = vshll.u32 %v236_v7, 23  ;;  %v351_v9 = vsub.s32 32, %v350_v32  ;;  %v234_v39 = vor.u32 %v233_v10, %v232_v21 }
 0x273   :  { %v116_v58 = vshll.u32 %v115_v53, 23  ;;  %v356_v15 = vadd.s32 127, %v355_v42  ;;  %v475_v37 = vsub.s32 4294967266, %v470_v63  ;;  %v113_v43 = vor.u32 %v112_v48, %v111_v49 }
 0x274   :  { %v238_v60 = vor.u32 4788187, %v237_v46  ;;  %v352_v17 = vshll.u32 %v343_v41, %v350_v32  ;;  %v353_v35 = vshrl.u32 %v335_v28, %v351_v9  ;;  %v455_v50 = vadd.s32 %v2828_v47, %v2838_v62 }
 0x275   :  { %v117_v61 = vor.u32 4788187, %v116_v58  ;;  %v357_v29 = vshll.u32 %v356_v15, 23  ;;  %v471_v3 = vsub.s32 32, %v470_v63  ;;  %v476_v0 = vadd.s32 127, %v475_v37 }
 0x276   :  { %v239_v1 = vand.u32 2147483647, %v238_v60  ;;  %v241_v5 = vcvt.s32.f32 %v234_v39  ;;  %v120_v55 = vcvt.s32.f32 %v113_v43  ;;  %v354_v6 = vor.u32 %v353_v35, %v352_v17 }
 0x277   :  { %v118_v25 = vand.u32 2147483647, %v117_v61  ;;  %v358_v31 = vor.u32 4788187, %v357_v29  ;;  %v472_v16 = vshll.u32 %v2873_v40, %v470_v63  ;;  %v473_v22 = vshrl.u32 %v455_v50, %v471_v3 }
 0x278   :  { %v477_v19 = vshll.u32 %v476_v0, 23  ;;  %v242_v14 = vmul.f32 %v241_v5, %v239_v1  ;;  %v361_v24 = vcvt.s32.f32 %v354_v6  ;;  %v245_v10 = vsub.s32 4, %v2861_v11 }
 0x279   :  { %v121_v23 = vmul.f32 %v120_v55, %v118_v25  ;;  %v359_v41 = vand.u32 2147483647, %v358_v31  ;;  %v474_v34 = vor.u32 %v473_v22, %v472_v16  ;;  %v124_v46 = vsub.s32 4, %v2863_v52 }
 0x27a   :  { %v478_v26 = vor.u32 4788187, %v477_v19  ;;  %v243_v4 = vxor.u32 2147483648, %v242_v14  ;;  %v246_v48 = vsel %vm161_vm6, %v245_v10, %v2861_v11  ;;  %v365_v9 = vsub.s32 4, %v2867_v27  ;;  %v1320_v19 = vpop.permute.xlu1 %1319 }
 0x27b   :  { %v122_v47 = vxor.u32 2147483648, %v121_v23  ;;  %v362_v62 = vmul.f32 %v361_v24, %v359_v41  ;;  %v481_v2 = vcvt.s32.f32 %v474_v34  ;;  %v125_v58 = vsel %vm40_vm7, %v124_v46, %v2863_v52 }
 0x27c   :  { %v479_v32 = vand.u32 2147483647, %v478_v26  ;;  %v244_v57 = vsel %vm161_vm6, %v243_v4, %v242_v14  ;;  %v248_v15 = vsel %vm2890_vm8, 0, %v246_v48  ;;  %v127_v39 = vsel %vm2898_vm9, 0, %v125_v58 }
 0x27d   :  { %v123_v20 = vsel %vm40_vm7, %v122_v47, %v121_v23  ;;  %v363_v51 = vxor.u32 2147483648, %v362_v62  ;;  %v247_v33 = vsel %vm2890_vm8, %v2556_v8, %v244_v57  ;;  %v366_v52 = vsel %vm281_vm10, %v365_v9, %v2867_v27 }
 0x27e   :  { %v482_v53 = vmul.f32 %v481_v2, %v479_v32  ;;  %v126_v42 = vsel %vm2898_vm9, %v2561_v54, %v123_v20  ;;  %2272 = vcosq.f32 %v247_v33  ;;  %v485_v60 = vsub.s32 4, %v2870_v56 }
 0x27f   :  { %v364_v63 = vsel %vm281_vm10, %v363_v51, %v362_v62  ;;  %2274 = vsinq.f32 %v247_v33  ;;  %v252_v61 = vand.u32 3, %v248_v15  ;;  %v131_v35 = vand.u32 3, %v127_v39  ;;  %v264_v62 = vpop.permute.xlu1 %263 }
 0x280   :  { %v483_v21 = vxor.u32 2147483648, %v482_v53  ;;  %2276 = vcosq.f32 %v126_v42  ;;  %v367_v59 = vsel %vm2913_vm11, %v2566_v13, %v364_v63  ;;  %v368_v29 = vsel %vm2913_vm11, 0, %v366_v52 }
 0x281   :  { %2278 = vsinq.f32 %v126_v42  ;;  %v486_v0 = vsel %vm401_vm12, %v485_v60, %v2870_v56  ;;  %vm254_vm14 = vcmp.eq.s32.totalorder %v252_v61, 0  ;;  %vm257_vm15 = vcmp.eq.s32.totalorder %v252_v61, 2 }
 0x282   :  { %v484_v49 = vsel %vm401_vm12, %v483_v21, %v482_v53  ;;  %2280 = vcosq.f32 %v367_v59  ;;  %vm133_vm0 = vcmp.eq.s32.totalorder %v131_v35, 0  ;;  %vm136_vm1 = vcmp.eq.s32.totalorder %v131_v35, 2  ;;  %v144_v53 = vpop.permute.xlu0 %143 }
 0x283   :  { %2282 = vsinq.f32 %v367_v59  ;;  %v487_v44 = vsel %vm2927_vm13, %v2571_v18, %v484_v49  ;;  %v372_v55 = vand.u32 3, %v368_v29  ;;  %v488_v6 = vsel %vm2927_vm13, 0, %v486_v0  ;;  %v384_v49 = vpop.permute.xlu1 %383 }
 0x284   :  { %2284 = vcosq.f32 %v487_v44  ;;  %vm253_vm2 = vcmp.lt.s32.totalorder %v252_v61, 2  ;;  %vm132_vm3 = vcmp.lt.s32.totalorder %v131_v35, 2  ;;  %v492_v34 = vand.u32 3, %v488_v6 }
 0x285   :  { %2286 = vsinq.f32 %v487_v44  ;;  %vm374_vm4 = vcmp.eq.s32.totalorder %v372_v55, 0  ;;  %vm377_vm5 = vcmp.eq.s32.totalorder %v372_v55, 2  ;;  %vm251_vm6 = vweird.f32 %v2556_v8 }
 0x286   :  { %vm130_vm7 = vweird.f32 %v2561_v54  ;;  %vm373_vm8 = vcmp.lt.s32.totalorder %v372_v55, 2  ;;  %vm494_vm9 = vcmp.eq.s32.totalorder %v492_v34, 0  ;;  %vm497_vm10 = vcmp.eq.s32.totalorder %v492_v34, 2  ;;  %v2290_v54 = vld [vmem:[%s2973_s0 + $0x4] sm:$0xf] }
 0x287   :  { %vm371_vm11 = vweird.f32 %v2566_v13  ;;  %v271_v12 = vsub.f32 %v2290_v54, %v2422_v36  ;;  %vm493_vm12 = vcmp.lt.s32.totalorder %v492_v34, 2  ;;  %v151_v28 = vsub.f32 %v2290_v54, %v2415_v30  ;;  %v504_v36 = vpop.permute.xlu0 %503 }
 0x288   :  { %v2273_v37 = vpop.eup %2272  ;;  %vm491_vm13 = vweird.f32 %v2571_v18  ;;  %v391_v15 = vsub.f32 %v2290_v54, %v2427_v38  ;;  %v511_v60 = vsub.f32 %v2290_v54, %v2434_v45 }
 0x289   :  { %v2275_v11 = vpop.eup %2274  ;;  %v258_v3 = vxor.u32 2147483648, %v2273_v37 }
 0x28a   :  { %v2277_v43 = vpop.eup %2276  ;;  %v255_v50 = vxor.u32 2147483648, %v2275_v11 }
 0x28b   :  { %v2279_v17 = vpop.eup %2278  ;;  %v137_v5 = vxor.u32 2147483648, %v2277_v43  ;;  %v259_v16 = vsel %vm257_vm15, %v258_v3, %v2275_v11  ;;  %vm1820_vm15 = vcmask 1043456  }
 0x28c   :  { %v2281_v1 = vpop.eup %2280  ;;  %v134_v27 = vxor.u32 2147483648, %v2279_v17  ;;  %v256_v31 = vsel %vm254_vm14, %v2273_v37, %v255_v50 }
 0x28d   :  { %v2283_v25 = vpop.eup %2282  ;;  %v138_v56 = vsel %vm136_vm1, %v137_v5, %v2279_v17  ;;  %v378_v41 = vxor.u32 2147483648, %v2281_v1  ;;  %v260_v26 = vsel %vm253_vm2, %v256_v31, %v259_v16 }
 0x28e   :  { %v2285_v22 = vpop.eup %2284  ;;  %v135_v14 = vsel %vm133_vm0, %v2277_v43, %v134_v27  ;;  %v375_v23 = vxor.u32 2147483648, %v2283_v25  ;;  %v261_v51 = vsel %vm251_vm6, nan, %v260_v26 }
 0x28f   :  { %v2287_v24 = vpop.eup %2286  ;;  %v139_v4 = vsel %vm132_vm3, %v135_v14, %v138_v56  ;;  %v379_v2 = vsel %vm377_vm5, %v378_v41, %v2283_v25  ;;  %v498_v57 = vxor.u32 2147483648, %v2285_v22  ;;  %v266_v46 = vmul.f32 %v264_v62, %v261_v51 }
 0x290   :  { %v376_v32 = vsel %vm374_vm4, %v2281_v1, %v375_v23  ;;  %v495_v40 = vxor.u32 2147483648, %v2287_v24  ;;  %v140_v33 = vsel %vm130_vm7, nan, %v139_v4 }
 0x291   :  { %v380_v8 = vsel %vm373_vm8, %v376_v32, %v379_v2  ;;  %v499_v21 = vsel %vm497_vm10, %v498_v57, %v2287_v24  ;;  %v146_v59 = vmul.f32 %v144_v53, %v140_v33  ;;  %v272_v58 = vmul.f32 %v271_v12, %v266_v46 }
 0x292   :  { %v496_v63 = vsel %vm494_vm9, %v2285_v22, %v495_v40  ;;  %v381_v48 = vsel %vm371_vm11, nan, %v380_v8 }
 0x293   :  { %v500_v13 = vsel %vm493_vm12, %v496_v63, %v499_v21  ;;  %v152_v9 = vmul.f32 %v151_v28, %v146_v59  ;;  %v386_v44 = vmul.f32 %v384_v49, %v381_v48 }
 0x294   :  { %v501_v37 = vsel %vm491_vm13, nan, %v500_v13 }
 0x295   :  { %v273_v39 = vadd.f32 %v272_v58, %v152_v9  ;;  %v392_v11 = vmul.f32 %v391_v15, %v386_v44  ;;  %v506_v52 = vmul.f32 %v504_v36, %v501_v37 }
 0x297   :  { %v393_v30 = vadd.f32 %v392_v11, %v273_v39  ;;  %v512_v61 = vmul.f32 %v511_v60, %v506_v52 }
 0x299   :  { %v513_v29 = vadd.f32 %v512_v61, %v393_v30 }
 0x2fd   :  { %v1805_v47 = vpop.f32.mrb[0].mxu1 }
 0x2fe   :  { %v2169_v7 = vadd.f32 %v1805_v47, %v1320_v19  ;;  %v2080_v20 = vpop.f32.mrb[1].mxu1 }
 0x300   :  { %v1810_v42 = vmin.f32 %v2169_v7, 0.0  ;;  %vm1809_vm14 = vcmp.gt.f32.partialorder %v2169_v7, 0.0 }
 0x302   :  { %v1811_v10 = vmul.f32 1.442695, %v1810_v42 }
 0x304   :  { %2288 = vpow2.f32 %v1811_v10 }
 0x30e   :  { %v2289_v43 = vpop.eup %2288 }
 0x30f   :  { %v1852_v17 = vadd.f32 -1.0, %v2289_v43 }
 0x311   :  { %v1814_v35 = vsel %vm1809_vm14, %v2169_v7, %v1852_v17 }
 0x312   :  { %v1815_v18 = vmul.f32 1.25, %v1814_v35 }
 0x314   :  { %v1816_v50 = vmul.f32 %v1815_v18, %v513_v29 }
 0x316   :  { %v1818_v3 = vrot.slane %v1816_v50, 4 }
 0x318   :  { %v1821_v0 = vsel %vm1820_vm15, %v2290_v54, %v1818_v3 }
 0x319   :  { %1822 = vst [vmem:[%s2975_s2] sm:$0xff] %v1821_v0 }
 0x31a   :  { %1827 = vsyncpa [#allocation3], 1 }

</bundles_post_ra>
